<compile_context>
chip_gen: v7x
topology: tpu7x:2x2x1
jax: 0.10.0
libtpu: 0.0.40
codegen_flags: <defaults>
</compile_context>

<pallas_src>
import functools

import numpy as np
import jax
import jax.numpy as jnp
from jax.experimental import pallas as pl
from jax.experimental.pallas import tpu as pltpu

F32_EPS = float(np.finfo(np.float32).eps)


def _lane_width(n_outputs):
    # merged output row: [new_outs (n_out) | v | prob | zero padding], lane-dense
    return max(128, ((n_outputs + 2 + 127) // 128) * 128)


def _a2c_kernel(x_ref, signs_ref, wx_ref, aux_ref, out_ref, *, n_out, act):
    """Fused A2C forward step.

    x_ref     : (1, n_in)  current state (features on the lane axis)
    signs_ref : (1, L)     +/-1 per lane (only lanes [0, n_out) are used)
    wx_ref    : (n_in, L)  [W1 | w2x | w3x | 0...]  -> one MXU matmul
    aux_ref   : (8, L)     row0 b1, row1 w2o, row2 w3o (zero padded),
                           rows 3/4/5 lane 0 hold b2 / b3 / w3v
    out_ref   : (1, L)     lanes [0,n_out)=new_outs, lane n_out=v, n_out+1=prob
    """
    L = out_ref.shape[-1]
    x = x_ref[...]                                                      # (1, n_in)

    # --- single MXU matmul covering the x-side of all three heads ------------
    z = jnp.dot(x, wx_ref[...], preferred_element_type=jnp.float32)     # (1, L)

    b1  = aux_ref[0:1, :]            # (1, L)
    w2o = aux_ref[1:2, :]            # (1, L), zero outside [0, n_out)
    w3o = aux_ref[2:3, :]            # (1, L), zero outside [0, n_out)
    b2  = aux_ref[3:4, 0:1]          # (1, 1)
    b3  = aux_ref[4:5, 0:1]          # (1, 1)
    w3v = aux_ref[5:6, 0:1]          # (1, 1)

    # policy head; padded lanes are harmless (zero-padded weights mask them in
    # the reductions below, and the final lane-select discards them).
    outs = act(z + b1)                                                  # (1, L)

    lane = jax.lax.broadcasted_iota(jnp.int32, (1, L), 1)

    # scalar heads on VPU + XLU (no M=1 MXU dots)
    vx = jnp.sum(jnp.where(lane == n_out, z, 0.0), axis=-1, keepdims=True)
    px = jnp.sum(jnp.where(lane == n_out + 1, z, 0.0), axis=-1, keepdims=True)
    vo = jnp.sum(outs * w2o, axis=-1, keepdims=True)
    po = jnp.sum(outs * w3o, axis=-1, keepdims=True)

    v = vx + vo + b2                                                    # (1, 1)
    prob = jax.nn.sigmoid(px + po + v * w3v + b3)                       # (1, 1)

    # new_outs[i] = outs[i] +/- (1 - prob + eps)
    delta = (1.0 - prob) + F32_EPS
    new_outs = outs + signs_ref[...] * delta                            # (1, L)

    # single lane-dense merged store: [new_outs | v | prob | 0...]
    out_ref[...] = jnp.where(lane < n_out, new_outs,
                   jnp.where(lane == n_out, v,
                   jnp.where(lane == n_out + 1, prob, 0.0)))


def pack_params(params, n_inputs, n_outputs):
    """One-time layout glue (hoisted out of the per-step path)."""
    w1, b1, w2, b2, w3, b3 = params
    L = _lane_width(n_outputs)

    wx = jnp.zeros((n_inputs, L), jnp.float32)
    wx = wx.at[:, :n_outputs].set(w1.astype(jnp.float32))
    wx = wx.at[:, n_outputs].set(w2[:n_inputs, 0].astype(jnp.float32))
    wx = wx.at[:, n_outputs + 1].set(w3[:n_inputs, 0].astype(jnp.float32))

    aux = jnp.zeros((8, L), jnp.float32)
    aux = aux.at[0, :n_outputs].set(b1.astype(jnp.float32))
    aux = aux.at[1, :n_outputs].set(w2[n_inputs:, 0].astype(jnp.float32))
    aux = aux.at[2, :n_outputs].set(
        w3[n_inputs:n_inputs + n_outputs, 0].astype(jnp.float32))
    aux = aux.at[3, 0].set(b2[0])
    aux = aux.at[4, 0].set(b3[0])
    aux = aux.at[5, 0].set(w3[n_inputs + n_outputs, 0])
    return wx, aux


def make_a2c_forward(n_inputs, n_outputs, activation_out="sigmoid"):
    """Build the jitted per-step forward (x, signs_row, wx, aux) -> (new_outs, v, prob)."""
    L = _lane_width(n_outputs)
    act = jax.nn.sigmoid if activation_out == "sigmoid" else jnp.tanh
    kernel = functools.partial(_a2c_kernel, n_out=n_outputs, act=act)
    vmem = pl.BlockSpec(memory_space=pltpu.MemorySpace.VMEM)

    call = pl.pallas_call(
        kernel,
        out_shape=jax.ShapeDtypeStruct((1, L), jnp.float32),
        in_specs=[vmem, vmem, vmem, vmem],
        out_specs=vmem,
    )

    @jax.jit
    def forward(x, signs_row, wx, aux):
        out_row = call(x.reshape(1, n_inputs).astype(jnp.float32),
                       signs_row.reshape(1, L).astype(jnp.float32),
                       wx, aux)
        new_outs = out_row[0, :n_outputs]
        v = out_row[0, n_outputs:n_outputs + 1]
        prob = out_row[0, n_outputs + 1:n_outputs + 2]
        return new_outs, v, prob

    return forward


def init_params(key, n_inputs, n_outputs):
    """Deterministic PyTorch-style nn.Linear init: U(-1/sqrt(fan_in), 1/sqrt(fan_in))."""
    def linear(k, fan_in, fan_out):
        kw, kb = jax.random.split(k)
        bound = 1.0 / np.sqrt(fan_in)
        w = jax.random.uniform(kw, (fan_in, fan_out), jnp.float32, -bound, bound)
        b = jax.random.uniform(kb, (fan_out,), jnp.float32, -bound, bound)
        return w, b

    k1, k2, k3 = jax.random.split(key, 3)
    w1, b1 = linear(k1, n_inputs, n_outputs)
    w2, b2 = linear(k2, n_inputs + n_outputs, 1)
    w3, b3 = linear(k3, n_inputs + n_outputs + 1, 1)
    return w1, b1, w2, b2, w3, b3


def reference_forward(x, params, signs):
    """Plain-JAX reference mirroring the PyTorch forward exactly."""
    w1, b1, w2, b2, w3, b3 = params
    outs = jax.nn.sigmoid(x @ w1 + b1)
    xo = jnp.concatenate([x, outs], axis=0)
    v = xo @ w2 + b2
    xov = jnp.concatenate([xo, v], axis=0)
    prob = jax.nn.sigmoid(xov @ w3 + b3)
    new_outs = outs + signs * (1.0 - prob + F32_EPS)
    return new_outs, v, prob


if __name__ == "__main__":
    n_inputs, n_outputs = 16, 8
    L = _lane_width(n_outputs)

    key = jax.random.PRNGKey(0)
    kx, kp, ks = jax.random.split(key, 3)

    x = jax.random.normal(kx, (n_inputs,), dtype=jnp.float32)
    params = init_params(kp, n_inputs, n_outputs)

    # random +/-1 signs drawn directly at full lane width (only the first
    # n_outputs lanes are used); replaces the per-element np.random coin flip.
    signs_row = jnp.where(jax.random.bernoulli(ks, 0.5, (L,)), 1.0, -1.0)
    signs_row = signs_row.astype(jnp.float32)

    wx, aux = pack_params(params, n_inputs, n_outputs)   # one-time packing
    forward = make_a2c_forward(n_inputs, n_outputs)      # one-time build

    new_outs, v, prob = forward(x, signs_row, wx, aux)
    jax.block_until_ready((new_outs, v, prob))

    ref_outs, ref_v, ref_prob = reference_forward(x, params, signs_row[:n_outputs])
    np.testing.assert_allclose(np.asarray(new_outs), np.asarray(ref_outs),
                               rtol=1e-5, atol=1e-5)
    np.testing.assert_allclose(np.asarray(v), np.asarray(ref_v),
                               rtol=1e-5, atol=1e-5)
    np.testing.assert_allclose(np.asarray(prob), np.asarray(ref_prob),
                               rtol=1e-5, atol=1e-5)

    print("KERNEL_OK")
</pallas_src>

<mosaic_0001>
module attributes {stable_mosaic.version = 11 : i64} {
  func.func @_a2c_kernel(%arg0: memref<1x16xf32, #tpu.memory_space<vmem>>, %arg1: memref<1x128xf32, #tpu.memory_space<vmem>>, %arg2: memref<16x128xf32, #tpu.memory_space<vmem>>, %arg3: memref<8x128xf32, #tpu.memory_space<vmem>>, %arg4: memref<1x128xf32, #tpu.memory_space<vmem>>) attributes {dimension_semantics = [], scalar_prefetch = 0 : i64, scratch_operands = 0 : i64, tpu.core_type = #tpu.core_type<tc>} {
    %c0 = arith.constant 0 : index
    %c0_0 = arith.constant 0 : index
    %0 = vector.load %arg0[%c0, %c0_0] : memref<1x16xf32, #tpu.memory_space<vmem>>, vector<1x16xf32>
    %c0_1 = arith.constant 0 : index
    %c0_2 = arith.constant 0 : index
    %1 = vector.load %arg2[%c0_1, %c0_2] : memref<16x128xf32, #tpu.memory_space<vmem>>, vector<16x128xf32>
    %cst = arith.constant dense<0.000000e+00> : vector<1x128xf32>
    %2 = tpu.matmul %0, %1, %cst {dimension_numbers = #tpu.dot_dimension_numbers<[1], [0], [0], [1], [0, 0, 1, 1], [], []>} : vector<1x16xf32>, vector<16x128xf32>, vector<1x128xf32> -> vector<1x128xf32>
    %c0_3 = arith.constant 0 : index
    %c0_4 = arith.constant 0 : index
    %3 = vector.load %arg3[%c0_3, %c0_4] : memref<8x128xf32, #tpu.memory_space<vmem>>, vector<1x128xf32>
    %c1 = arith.constant 1 : index
    %c0_5 = arith.constant 0 : index
    %4 = vector.load %arg3[%c1, %c0_5] : memref<8x128xf32, #tpu.memory_space<vmem>>, vector<1x128xf32>
    %c2 = arith.constant 2 : index
    %c0_6 = arith.constant 0 : index
    %5 = vector.load %arg3[%c2, %c0_6] : memref<8x128xf32, #tpu.memory_space<vmem>>, vector<1x128xf32>
    %c3 = arith.constant 3 : index
    %c0_7 = arith.constant 0 : index
    %6 = vector.load %arg3[%c3, %c0_7] : memref<8x128xf32, #tpu.memory_space<vmem>>, vector<1x1xf32>
    %c4 = arith.constant 4 : index
    %c0_8 = arith.constant 0 : index
    %7 = vector.load %arg3[%c4, %c0_8] : memref<8x128xf32, #tpu.memory_space<vmem>>, vector<1x1xf32>
    %c5 = arith.constant 5 : index
    %c0_9 = arith.constant 0 : index
    %8 = vector.load %arg3[%c5, %c0_9] : memref<8x128xf32, #tpu.memory_space<vmem>>, vector<1x1xf32>
    %9 = arith.addf %2, %3 : vector<1x128xf32>
    %10 = arith.negf %9 : vector<1x128xf32>
    %11 = math.exp %10 : vector<1x128xf32>
    %cst_10 = arith.constant 1.000000e+00 : f32
    %12 = vector.broadcast %cst_10 : f32 to vector<1x128xf32>
    %13 = arith.addf %12, %11 : vector<1x128xf32>
    %14 = arith.divf %12, %13 : vector<1x128xf32>
    %15 = tpu.iota {dimensions = array<i32: 1>} : vector<1x128xi32>
    %c8_i32 = arith.constant 8 : i32
    %16 = vector.broadcast %c8_i32 : i32 to vector<1x128xi32>
    %17 = arith.cmpi eq, %15, %16 : vector<1x128xi32>
    %cst_11 = arith.constant 0.000000e+00 : f32
    %18 = vector.broadcast %cst_11 : f32 to vector<1x128xf32>
    %19 = arith.select %17, %2, %18 : vector<1x128xi1>, vector<1x128xf32>
    %cst_12 = arith.constant dense<0.000000e+00> : vector<1xf32>
    %20 = vector.multi_reduction <add>, %19, %cst_12 [1] : vector<1x128xf32> to vector<1xf32>
    %21 = vector.shape_cast %20 : vector<1xf32> to vector<1x1xf32>
    %c9_i32 = arith.constant 9 : i32
    %22 = vector.broadcast %c9_i32 : i32 to vector<1x128xi32>
    %23 = arith.cmpi eq, %15, %22 : vector<1x128xi32>
    %cst_13 = arith.constant 0.000000e+00 : f32
    %24 = vector.broadcast %cst_13 : f32 to vector<1x128xf32>
    %25 = arith.select %23, %2, %24 : vector<1x128xi1>, vector<1x128xf32>
    %cst_14 = arith.constant dense<0.000000e+00> : vector<1xf32>
    %26 = vector.multi_reduction <add>, %25, %cst_14 [1] : vector<1x128xf32> to vector<1xf32>
    %27 = vector.shape_cast %26 : vector<1xf32> to vector<1x1xf32>
    %28 = arith.mulf %14, %4 : vector<1x128xf32>
    %cst_15 = arith.constant dense<0.000000e+00> : vector<1xf32>
    %29 = vector.multi_reduction <add>, %28, %cst_15 [1] : vector<1x128xf32> to vector<1xf32>
    %30 = vector.shape_cast %29 : vector<1xf32> to vector<1x1xf32>
    %31 = arith.mulf %14, %5 : vector<1x128xf32>
    %cst_16 = arith.constant dense<0.000000e+00> : vector<1xf32>
    %32 = vector.multi_reduction <add>, %31, %cst_16 [1] : vector<1x128xf32> to vector<1xf32>
    %33 = vector.shape_cast %32 : vector<1xf32> to vector<1x1xf32>
    %34 = arith.addf %21, %30 : vector<1x1xf32>
    %35 = arith.addf %34, %6 : vector<1x1xf32>
    %36 = arith.addf %27, %33 : vector<1x1xf32>
    %37 = arith.mulf %35, %8 : vector<1x1xf32>
    %38 = arith.addf %36, %37 : vector<1x1xf32>
    %39 = arith.addf %38, %7 : vector<1x1xf32>
    %40 = arith.negf %39 : vector<1x1xf32>
    %41 = math.exp %40 : vector<1x1xf32>
    %cst_17 = arith.constant 1.000000e+00 : f32
    %42 = vector.broadcast %cst_17 : f32 to vector<1x1xf32>
    %43 = arith.addf %42, %41 : vector<1x1xf32>
    %44 = arith.divf %42, %43 : vector<1x1xf32>
    %cst_18 = arith.constant 1.000000e+00 : f32
    %45 = vector.broadcast %cst_18 : f32 to vector<1x1xf32>
    %46 = arith.subf %45, %44 : vector<1x1xf32>
    %cst_19 = arith.constant 1.1920929E-7 : f32
    %47 = vector.broadcast %cst_19 : f32 to vector<1x1xf32>
    %48 = arith.addf %46, %47 : vector<1x1xf32>
    %c0_20 = arith.constant 0 : index
    %c0_21 = arith.constant 0 : index
    %49 = vector.load %arg1[%c0_20, %c0_21] : memref<1x128xf32, #tpu.memory_space<vmem>>, vector<1x128xf32>
    %50 = vector.broadcast %48 : vector<1x1xf32> to vector<1x128xf32>
    %51 = arith.mulf %49, %50 : vector<1x128xf32>
    %52 = arith.addf %14, %51 : vector<1x128xf32>
    %c8_i32_22 = arith.constant 8 : i32
    %53 = vector.broadcast %c8_i32_22 : i32 to vector<1x128xi32>
    %54 = arith.cmpi slt, %15, %53 : vector<1x128xi32>
    %c8_i32_23 = arith.constant 8 : i32
    %55 = vector.broadcast %c8_i32_23 : i32 to vector<1x128xi32>
    %56 = arith.cmpi eq, %15, %55 : vector<1x128xi32>
    %c9_i32_24 = arith.constant 9 : i32
    %57 = vector.broadcast %c9_i32_24 : i32 to vector<1x128xi32>
    %58 = arith.cmpi eq, %15, %57 : vector<1x128xi32>
    %cst_25 = arith.constant 0.000000e+00 : f32
    %59 = vector.shape_cast %44 : vector<1x1xf32> to vector<1x1xf32>
    %60 = vector.broadcast %59 : vector<1x1xf32> to vector<1x128xf32>
    %61 = vector.broadcast %cst_25 : f32 to vector<1x128xf32>
    %62 = arith.select %58, %60, %61 : vector<1x128xi1>, vector<1x128xf32>
    %63 = vector.shape_cast %35 : vector<1x1xf32> to vector<1x1xf32>
    %64 = vector.broadcast %63 : vector<1x1xf32> to vector<1x128xf32>
    %65 = arith.select %56, %64, %62 : vector<1x128xi1>, vector<1x128xf32>
    %66 = arith.select %54, %52, %65 : vector<1x128xi1>, vector<1x128xf32>
    %c0_26 = arith.constant 0 : index
    %c0_27 = arith.constant 0 : index
    %67 = vector.load %arg4[%c0_26, %c0_27] : memref<1x128xf32, #tpu.memory_space<vmem>>, vector<1x128xf32>
    tpu.vector_store %arg4[%c0_26, %c0_27], %66 {strides = array<i32>} : memref<1x128xf32, #tpu.memory_space<vmem>>, vector<1x128xf32>,
    return
  }
}

</mosaic_0001>

<bundles_post_ra>
// kernel: forward.1
= control target key start
LH: loop header
LB: loop body
LE: loop exit
PB: predicated region body
PF: predicated region fallthrough
CT: control target
= control target key end

     0   :  { %9 = vsyncpa [#allocation3], 0  ;;  %s241_s15 = smov [#allocation2]   ;;  %s329_s0 = inlined_call_operand.vmem [shape: f32[1,16], index: 0, kind: input, shape index: {}]   ;;  %s330_s1 = inlined_call_operand.vmem [shape: f32[1,128], index: 1, kind: input, shape index: {}]   ;;  %s331_s2 = inlined_call_operand.hbm [shape: f32[16,128], index: 2, kind: input, shape index: {}]   ;;  %s332_s3 = inlined_call_operand.vmem [shape: f32[8,128], index: 3, kind: input, shape index: {}]   ;;  %s333_s4 = inlined_call_operand.vmem [shape: f32[1,128], index: 4, kind: output, shape index: {}]  }
   0x1   :  { %s19_s16 = sshll.u32 %s241_s15, 4  ;;  %s217_s19 = scalar_lea.hbm %s331_s2, 256  ;;  %s20_s16 = int_to_ptr.vmem [resolvable:$true] %s19_s16 }
   0x2   :  { %p218_p0 = scmp.ne.s32.totalorder %s331_s2, %s217_s19  ;;  %p221_p1 = scmp.lt.u32.totalorder %s217_s19, %s331_s2 }
   0x4   :  { %p223_p2 = pnand %p221_p1, %p218_p0 }
   0x6   :  { %226 = shalt.err (!%p223_p2)
}
   0x7   :  { %s227_s24 = scalar_lea.vmem %s20_s16, 256  ;;  %p232_p4 = scmp.lt.s32.totalorder %s20_s16, %s20_s16 }
   0x8   :  { %p228_p3 = scmp.ne.s32.totalorder %s20_s16, %s227_s24  ;;  %p233_p5 = scmp.lt.s32.totalorder %s227_s24, %s227_s24 }
   0xa   :  { %p234_p6 = por %p233_p5, %p232_p4 }
   0xc   :  { %p235_p7 = pnand %p234_p6, %p228_p3 }
   0xe   :  { %238 = shalt.err (!%p235_p7)
}
   0xf   :  { %s242_s25 = smov 128   ;;  %s243_s26 = smov 8  }
  0x10   :  { %25 = dma.hbm_to_vmem [thread:$0]  %s331_s2, 256, %s20_s16, [#allocation3], %s242_s25, %s242_s25, %s243_s26  }
  0x11   :  { %239 = dma.done.wait [#allocation3], 256  }
  0x12   :  { %240 = vsyncadd [#allocation3], 4294967040  ;;  %v244_v0 = vmov 0.0|0.0   ;;  %vm245_vm0 = vmmov 0   ;;  %v246_v1 = vmov 0.0   ;;  %v32_v2 = vld [vmem:[#allocation2] sm:$0xff]  ;;  %v121_v6 = vlaneseq }
  0x13   :  { %197 = vmatprep.subr.bf16.mxu0 %v244_v0  ;;  %194 = vmatprep.mubr.msk.f32.mxu0 %vm245_vm0, %v246_v1  ;;  %v33_v3 = vld [vmem:[#allocation2 + $0x8] sm:$0xff]  ;;  %v31_v5 = vld [vmem:[%s329_s0] sm:$0x1]  ;;  %vm34_vm1 = vcmask 130048   ;;  %vm125_vm4 = vcmask 1040384   ;;  %v247_v26 = vmov 0  }
  0x14   :  { %v198_v4 = vpack.c.bf16 %v33_v3, %v32_v2  ;;  %v288_v7 = vand.u32 127, %v121_v6  ;;  %v108_v8 = vld [vmem:[%s332_s3] sm:$0x1]  ;;  %v110_v19 = vld [vmem:[%s332_s3 + $0x2] sm:$0x1]  ;;  %208 = vset.pattern.permute.xlu1 %v247_v26  ;;  %207 = vset.pattern.permute.xlu0 %v247_v26 }
  0x15   :  { %v109_v20 = vld [vmem:[%s332_s3 + $0x1] sm:$0x1]  ;;  %v111_v29 = vld [vmem:[%s332_s3 + $0x3] sm:$0x1]  ;;  %v113_v33 = vld [vmem:[%s332_s3 + $0x5] sm:$0x1] }
  0x16   :  { %199 = vmatpush3.bf16.msra.mxu0 %v198_v4  ;;  %vm129_vm2 = vcmp.eq.s32.totalorder %v288_v7, 9  ;;  %vm123_vm3 = vcmp.eq.s32.totalorder %v288_v7, 8  ;;  %v112_v37 = vld [vmem:[%s332_s3 + $0x4] sm:$0x1]  ;;  %v156_v47 = vld [vmem:[%s330_s1] sm:$0x1] }
  0x17   :  { %vm164_vm5 = vcmp.lt.s32.totalorder %v288_v7, 8 }
  0x19   :  { %195 = vmatmul.mubr.msk.f32.vlgmr.msra.gmra.mrb[0].mxu0 %vm34_vm1, %v31_v5 }
  0xec   :  { %v104_v9 = vpop.f32.mrb[0].mxu0 }
  0xed   :  { %v114_v10 = vadd.f32 %v108_v8, %v104_v9  ;;  %v196_v11 = vpop.f32.mrb[1].mxu0  ;;  %v130_v12 = vsel %vm129_vm2, %v104_v9, 0.0  ;;  %v124_v13 = vsel %vm123_vm3, %v104_v9, 0.0 }
  0xee   :  { %v131_v14 = vsel %vm125_vm4, %v130_v12, 0.0  ;;  %v126_v15 = vsel %vm125_vm4, %v124_v13, 0.0 }
  0xef   :  { %v185_v16 = vmul.f32 -1.442695, %v114_v10  ;;  %132 = vadd.xlane.f32.xlu1 %v131_v14  ;;  %127 = vadd.xlane.f32.xlu0 %v126_v15 }
  0xf1   :  { %209 = vpow2.f32 %v185_v16 }
  0xfb   :  { %v210_v17 = vpop.eup %209 }
  0xfc   :  { %v118_v18 = vadd.f32 1.0, %v210_v17 }
  0xfe   :  { %211 = vrcp.f32 %v118_v18 }
 0x108   :  { %v212_v21 = vpop.eup %211 }
 0x109   :  { %v138_v22 = vmul.f32 %v212_v21, %v110_v19  ;;  %v134_v23 = vmul.f32 %v212_v21, %v109_v20 }
 0x10b   :  { %v139_v24 = vsel %vm125_vm4, %v138_v22, 0.0  ;;  %v135_v25 = vsel %vm125_vm4, %v134_v23, 0.0 }
 0x10c   :  { %140 = vadd.xlane.f32.xlu1 %v139_v24  ;;  %136 = vadd.xlane.f32.xlu0 %v135_v25 }
 0x17c   :  { %v128_v27 = vpop.xlane.xlu0 %127  ;;  %v133_v28 = vpop.xlane.xlu1 %132 }
 0x199   :  { %v137_v30 = vpop.xlane.xlu0 %136  ;;  %v141_v32 = vpop.xlane.xlu1 %140 }
 0x19a   :  { %v142_v31 = vadd.f32 %v137_v30, %v128_v27  ;;  %v144_v35 = vadd.f32 %v141_v32, %v133_v28 }
 0x19c   :  { %v143_v34 = vadd.f32 %v142_v31, %v111_v29 }
 0x19e   :  { %v145_v36 = vmul.f32 %v143_v34, %v113_v33 }
 0x1a0   :  { %v146_v38 = vadd.f32 %v145_v36, %v144_v35 }
 0x1a2   :  { %v147_v39 = vadd.f32 %v146_v38, %v112_v37 }
 0x1a4   :  { %v186_v40 = vmul.f32 -1.442695, %v147_v39 }
 0x1a6   :  { %213 = vpow2.f32 %v186_v40 }
 0x1b0   :  { %v214_v41 = vpop.eup %213 }
 0x1b1   :  { %v151_v42 = vadd.f32 1.0, %v214_v41 }
 0x1b3   :  { %215 = vrcp.f32 %v151_v42 }
 0x1bd   :  { %v216_v43 = vpop.eup %215 }
 0x1be   :  { %167 = vperm.xlu1 %208, %v216_v43   ;;  %v154_v44 = vsub.f32 1.0, %v216_v43 }
 0x1c0   :  { %v155_v45 = vadd.f32 1.1920929e-07, %v154_v44 }
 0x1c2   :  { %173 = vperm.xlu1 %208, %v143_v34   ;;  %159 = vperm.xlu0 %207, %v155_v45  }
 0x23d   :  { %v168_v46 = vpop.permute.xlu1 %167 }
 0x23e   :  { %v170_v51 = vsel %vm129_vm2, %v168_v46, 0.0 }
 0x241   :  { %v160_v48 = vpop.permute.xlu0 %159  ;;  %v174_v49 = vpop.permute.xlu1 %173 }
 0x242   :  { %v162_v50 = vmul.f32 %v160_v48, %v156_v47  ;;  %v176_v53 = vsel %vm123_vm3, %v174_v49, %v170_v51 }
 0x244   :  { %v163_v52 = vadd.f32 %v212_v21, %v162_v50 }
 0x246   :  { %v177_v54 = vsel %vm164_vm5, %v163_v52, %v176_v53 }
 0x247   :  { %178 = vst [vmem:[%s333_s4] sm:$0x1] %v177_v54 }
 0x248   :  { %183 = vsyncpa [#allocation3], 1 }

</bundles_post_ra>
